<compile_context>
chip_gen: v7x
topology: tpu7x:2x2x1
jax: 0.10.0
libtpu: 0.0.40
codegen_flags: <defaults>
</compile_context>

<pallas_src>
import re

import jax
import jax.numpy as jnp
from jax.experimental import pallas as pl
from jax.experimental.pallas import tpu as pltpu

MAX_WORDS = 16            # self.max_words in the PyTorch module
VOCAB = 128               # synthetic vocab size (index 0 == padding token)
EMBED_DIM = 128           # synthetic word2vec embedding dim (lane axis)
SENTS_PER_BLOCK = 8       # sentences per grid step
ROWS_PER_BLOCK = SENTS_PER_BLOCK * MAX_WORDS   # 128 rows: one full MXU pass


# ----------------------------- Pallas kernel ------------------------------ #
def embed_onehot_kernel(ids_ref, table_ref, out_ref):
    """Gather ROWS_PER_BLOCK embedding rows via a one-hot MXU matmul.

    ids_ref   : (ROWS_PER_BLOCK, 1) int32 VMEM  -- token ids for this block
    table_ref : (VOCAB, EMBED_DIM) f32 VMEM     -- constant block index, so the
                                                   table is DMA'd once and stays
                                                   VMEM-resident across steps
    out_ref   : (ROWS_PER_BLOCK, EMBED_DIM) f32 VMEM output block
    """
    ids = jnp.clip(ids_ref[...], 0, VOCAB - 1)                    # (128, 1)
    iota = jax.lax.broadcasted_iota(jnp.int32, (ROWS_PER_BLOCK, VOCAB), 1)
    onehot = (iota == ids).astype(table_ref.dtype)                # (128, VOCAB)
    out_ref[...] = jnp.dot(onehot, table_ref[...],
                           preferred_element_type=jnp.float32)


def embedding_lookup(ids, table):
    """ids: (B, MAX_WORDS) or (MAX_WORDS,) int32; table: (VOCAB, EMBED_DIM) f32.

    Returns (B, MAX_WORDS, EMBED_DIM) f32 (B=1 matches the torch output shape).
    """
    ids = jnp.asarray(ids, jnp.int32)
    if ids.ndim == 1:
        ids = ids[None]
    batch = ids.shape[0]

    # Pad the batch to a multiple of SENTS_PER_BLOCK with all-pad sentences
    # (token 0); padded rows are sliced off after the kernel.
    num_blocks = -(-batch // SENTS_PER_BLOCK)
    padded_batch = num_blocks * SENTS_PER_BLOCK
    if padded_batch != batch:
        ids = jnp.concatenate(
            [ids, jnp.zeros((padded_batch - batch, MAX_WORDS), jnp.int32)],
            axis=0)

    ids_col = ids.reshape(padded_batch * MAX_WORDS, 1)  # tiny lane-1 column

    grid_spec = pltpu.PrefetchScalarGridSpec(
        num_scalar_prefetch=0,
        grid=(num_blocks,),
        in_specs=[
            # ids: one (128, 1) column per grid step.
            pl.BlockSpec((ROWS_PER_BLOCK, 1), lambda b: (b, 0)),
            # table: constant block index -> fetched once, VMEM-resident.
            # TODO(synk): for a real word2vec vocab that exceeds VMEM
            # (~40-48 MiB on v7x, ~100 MiB on v5e/v6e) fall back to an
            # HBM-resident table with a manual double-buffered row gather.
            pl.BlockSpec((VOCAB, EMBED_DIM), lambda b: (0, 0)),
        ],
        out_specs=pl.BlockSpec((ROWS_PER_BLOCK, EMBED_DIM), lambda b: (b, 0)),
    )

    out_flat = pl.pallas_call(
        embed_onehot_kernel,
        out_shape=jax.ShapeDtypeStruct(
            (padded_batch * MAX_WORDS, EMBED_DIM), jnp.float32),
        grid_spec=grid_spec,
        compiler_params=pltpu.CompilerParams(
            dimension_semantics=("parallel",),  # v7x: split blocks over 2 TCs
        ),
    )(ids_col, table)

    return out_flat[: batch * MAX_WORDS].reshape(batch, MAX_WORDS, EMBED_DIM)


# ------------------------- host-side text handling ------------------------- #
# TODO(synk): regex tokenization + python-dict word->token lookup are host
# string ops with no Pallas equivalent; reproduced in plain Python below.
class TextPreprocessJax:
    def __init__(self, key):
        # Deterministic synthetic vocabulary (stands in for data/dict.npy).
        vocab_words = [
            "the", "quick", "brown", "fox", "jumps", "over", "lazy", "dog",
            "a", "hello", "world", "jax", "pallas", "tpu", "kernel", "text",
            "embedding", "lookup", "fast", "slow",
        ]
        self.max_words = MAX_WORDS
        self.word_to_token = {w: i + 1 for i, w in enumerate(vocab_words)}
        # Deterministic synthetic embedding table (stands in for word2vec.pth).
        # Kept f32 to match nn.Embedding.from_pretrained numerics exactly.
        self.word_embd = jax.random.normal(key, (VOCAB, EMBED_DIM), jnp.float32)

    def _split_text_to_lowercase(self, sentence):
        return [w.lower() for w in re.findall(r"[\w']+", str(sentence))]

    def _words_to_token(self, words):
        toks = [self.word_to_token[w] for w in words if w in self.word_to_token]
        toks = toks[: self.max_words]
        toks = toks + [0] * (self.max_words - len(toks))  # zero-pad (id 0 = pad)
        return toks

    def _words_to_ids(self, sentences):
        return jnp.asarray(
            [self._words_to_token(self._split_text_to_lowercase(s))
             for s in sentences],
            dtype=jnp.int32,
        )  # (B, MAX_WORDS)

    def forward(self, sentence):
        # Matches the PyTorch module: one sentence -> (1, MAX_WORDS, EMBED_DIM).
        ids = self._words_to_ids([sentence])
        return embedding_lookup(ids, self.word_embd)

    def forward_batch(self, sentences):
        # Batched path: amortizes per-call overhead and feeds the parallel grid.
        ids = self._words_to_ids(list(sentences))
        return embedding_lookup(ids, self.word_embd)


# ---------------------------------- main ----------------------------------- #
if __name__ == "__main__":
    key = jax.random.PRNGKey(0)
    model = TextPreprocessJax(key)

    # --- single-sentence path (same semantics as the PyTorch forward) ---
    sentence = "The quick brown Fox jumps over the LAZY dog, hello unknownword world!"
    out = jax.block_until_ready(model.forward(sentence))

    ids_ref = model._words_to_ids([sentence])                  # (1, 16)
    ref = jnp.take(model.word_embd, ids_ref, axis=0)           # (1, 16, 128)
    assert out.shape == (1, MAX_WORDS, EMBED_DIM), out.shape
    assert jnp.allclose(out, ref, atol=1e-6), "single-sentence kernel mismatch"

    # --- batched path (amortizes launch cost / exercises the parallel grid) ---
    sentences = [
        sentence,
        "hello world jax pallas tpu kernel",
        "a slow lazy dog and a fast fox",
        "",  # no known words -> all-pad (id 0) row
        "text embedding lookup is fast on the tpu kernel",
        "the lazy brown dog jumps over a quick fox",
        "pallas kernels over the world",
        "hello hello hello",
        "slow text",  # 9 sentences -> exercises batch padding to 16
    ]
    out_b = jax.block_until_ready(model.forward_batch(sentences))

    ids_b = model._words_to_ids(sentences)                     # (9, 16)
    ref_b = jnp.take(model.word_embd, ids_b, axis=0)           # (9, 16, 128)
    assert out_b.shape == (len(sentences), MAX_WORDS, EMBED_DIM), out_b.shape
    assert jnp.allclose(out_b, ref_b, atol=1e-6), "batched kernel mismatch"

    print("KERNEL_OK")
</pallas_src>

<mosaic_0001>
module attributes {stable_mosaic.version = 11 : i64} {
  func.func @embed_onehot_kernel(%arg0: i32, %arg1: memref<128x1xi32, #tpu.memory_space<vmem>>, %arg2: memref<128x128xf32, #tpu.memory_space<vmem>>, %arg3: memref<128x128xf32, #tpu.memory_space<vmem>>) attributes {dimension_semantics = [#tpu.dimension_semantics<parallel>], iteration_bounds = array<i64: 1>, scalar_prefetch = 0 : i64, scratch_operands = 0 : i64, tpu.core_type = #tpu.core_type<tc>, window_params = [{transform_indices = @transform_0, window_bounds = array<i64: 128, 1>}, {pipeline_mode = #tpu.pipeline_mode<synchronous>, transform_indices = @transform_1, window_bounds = array<i64: 128, 128>}, {transform_indices = @transform_2, window_bounds = array<i64: 128, 128>}]} {
    %c0 = arith.constant 0 : index
    %c0_0 = arith.constant 0 : index
    %0 = vector.load %arg1[%c0, %c0_0] : memref<128x1xi32, #tpu.memory_space<vmem>>, vector<128x1xi32>
    %c0_i32 = arith.constant 0 : i32
    %c127_i32 = arith.constant 127 : i32
    %1 = vector.broadcast %c0_i32 : i32 to vector<128x1xi32>
    %2 = arith.maxsi %1, %0 : vector<128x1xi32>
    %3 = vector.broadcast %c127_i32 : i32 to vector<128x1xi32>
    %4 = arith.minsi %3, %2 : vector<128x1xi32>
    %5 = tpu.iota {dimensions = array<i32: 1>} : vector<128x128xi32>
    %6 = vector.broadcast %4 : vector<128x1xi32> to vector<128x128xi32>
    %7 = arith.cmpi eq, %5, %6 : vector<128x128xi32>
    %8 = arith.extui %7 : vector<128x128xi1> to vector<128x128xi32>
    %9 = arith.sitofp %8 : vector<128x128xi32> to vector<128x128xf32>
    %c0_1 = arith.constant 0 : index
    %c0_2 = arith.constant 0 : index
    %10 = vector.load %arg2[%c0_1, %c0_2] : memref<128x128xf32, #tpu.memory_space<vmem>>, vector<128x128xf32>
    %cst = arith.constant dense<0.000000e+00> : vector<128x128xf32>
    %11 = tpu.matmul %9, %10, %cst {dimension_numbers = #tpu.dot_dimension_numbers<[1], [0], [0], [1], [0, 0, 1, 1], [], []>} : vector<128x128xf32>, vector<128x128xf32>, vector<128x128xf32> -> vector<128x128xf32>
    %c0_3 = arith.constant 0 : index
    %c0_4 = arith.constant 0 : index
    %12 = vector.load %arg3[%c0_3, %c0_4] : memref<128x128xf32, #tpu.memory_space<vmem>>, vector<128x128xf32>
    tpu.vector_store %arg3[%c0_3, %c0_4], %11 {strides = array<i32>} : memref<128x128xf32, #tpu.memory_space<vmem>>, vector<128x128xf32>,
    return
  }
  func.func @transform_0(%arg0: i32) -> (i32, i32) {
    %c0_i32 = arith.constant 0 : i32
    %c0_i32_0 = arith.constant 0 : i32
    return %arg0, %c0_i32 : i32, i32
  }
  func.func @transform_1(%arg0: i32) -> (i32, i32) {
    %c0_i32 = arith.constant 0 : i32
    %c0_i32_0 = arith.constant 0 : i32
    %c0_i32_1 = arith.constant 0 : i32
    return %c0_i32, %c0_i32_0 : i32, i32
  }
  func.func @transform_2(%arg0: i32) -> (i32, i32) {
    %c0_i32 = arith.constant 0 : i32
    %c0_i32_0 = arith.constant 0 : i32
    return %arg0, %c0_i32 : i32, i32
  }
}

</mosaic_0001>

<bundles_post_ra>
// kernel: tpu_custom_call.1
= control target key start
LH: loop header
LB: loop body
LE: loop exit
PB: predicated region body
PF: predicated region fallthrough
CT: control target
= control target key end

     0   :  { %v582_v3 = vmov 0   ;;  %s710_s0 = inlined_call_operand.vmem [shape: s32[128,1], index: 0, kind: input, shape index: {}]   ;;  %s711_s1 = inlined_call_operand.vmem [shape: f32[128,128], index: 1, kind: input, shape index: {}]   ;;  %s712_s2 = inlined_call_operand.hbm [shape: f32[128,128], index: 2, kind: output, shape index: {}]  }
   0x1   :  { %v13_v0 = vld [vmem:[%s710_s0 + $0x8] sm:$0xff]  ;;  %v12_v1 = vld [vmem:[%s710_s0] sm:$0xff]  ;;  %557 = vset.pattern.permute.xlu1 %v582_v3  ;;  %556 = vset.pattern.permute.xlu0 %v582_v3  ;;  %v22_v5 = vld [vmem:[%s710_s0 + $0x50] sm:$0xff] }
   0x2   :  { %v21_v2 = vld [vmem:[%s710_s0 + $0x48] sm:$0xff]  ;;  %vm30_vm0 = vcmp.gt.s32.totalorder %v13_v0, 0  ;;  %vm28_vm1 = vcmp.gt.s32.totalorder %v12_v1, 0  ;;  %v20_v4 = vld [vmem:[%s710_s0 + $0x40] sm:$0xff]  ;;  %v14_v9 = vld [vmem:[%s710_s0 + $0x10] sm:$0xff]  ;;  %vm48_vm8 = vcmp.gt.s32.totalorder %v22_v5, 0 }
   0x3   :  { %vm46_vm2 = vcmp.gt.s32.totalorder %v21_v2, 0  ;;  %v31_v6 = vsel %vm30_vm0, %v13_v0, 0  ;;  %v29_v7 = vsel %vm28_vm1, %v12_v1, 0  ;;  %vm44_vm3 = vcmp.gt.s32.totalorder %v20_v4, 0  ;;  %v23_v10 = vld [vmem:[%s710_s0 + $0x58] sm:$0xff]  ;;  %v24_v19 = vld [vmem:[%s710_s0 + $0x60] sm:$0xff] }
   0x4   :  { %v47_v8 = vsel %vm46_vm2, %v21_v2, 0  ;;  %vm62_vm4 = vcmp.lt.s32.totalorder %v31_v6, 127  ;;  %vm60_vm5 = vcmp.lt.s32.totalorder %v29_v7, 127  ;;  %v45_v11 = vsel %vm44_vm3, %v20_v4, 0  ;;  %v15_v12 = vld [vmem:[%s710_s0 + $0x18] sm:$0xff]  ;;  %v16_v20 = vld [vmem:[%s710_s0 + $0x20] sm:$0xff] }
   0x5   :  { %vm78_vm6 = vcmp.lt.s32.totalorder %v47_v8, 127  ;;  %v63_v13 = vsel %vm62_vm4, %v31_v6, 127  ;;  %v61_v14 = vsel %vm60_vm5, %v29_v7, 127  ;;  %vm76_vm7 = vcmp.lt.s32.totalorder %v45_v11, 127  ;;  %v25_v25 = vld [vmem:[%s710_s0 + $0x68] sm:$0xff]  ;;  %v26_v29 = vld [vmem:[%s710_s0 + $0x70] sm:$0xff] }
   0x6   :  { %98 = vperm.xlu1 %557, %v63_v13   ;;  %95 = vperm.xlu0 %556, %v61_v14   ;;  %v79_v15 = vsel %vm78_vm6, %v47_v8, 127  ;;  %vm32_vm9 = vcmp.gt.s32.totalorder %v14_v9, 0  ;;  %vm50_vm10 = vcmp.gt.s32.totalorder %v23_v10, 0  ;;  %v77_v16 = vsel %vm76_vm7, %v45_v11, 127  ;;  %v17_v26 = vld [vmem:[%s710_s0 + $0x28] sm:$0xff]  ;;  %v18_v32 = vld [vmem:[%s710_s0 + $0x30] sm:$0xff] }
   0x7   :  { %v49_v17 = vsel %vm48_vm8, %v22_v5, 0  ;;  %v33_v18 = vsel %vm32_vm9, %v14_v9, 0  ;;  %vm34_vm11 = vcmp.gt.s32.totalorder %v15_v12, 0  ;;  %v51_v21 = vsel %vm50_vm10, %v23_v10, 0  ;;  %v190_v33 = vld [vmem:[%s711_s1] sm:$0xff]  ;;  %v191_v34 = vld [vmem:[%s711_s1 + $0x8] sm:$0xff] }
   0x8   :  { %vm80_vm12 = vcmp.lt.s32.totalorder %v49_v17, 127  ;;  %vm64_vm13 = vcmp.lt.s32.totalorder %v33_v18, 127  ;;  %v35_v22 = vsel %vm34_vm11, %v15_v12, 0  ;;  %vm52_vm14 = vcmp.gt.s32.totalorder %v24_v19, 0  ;;  %v192_v35 = vld [vmem:[%s711_s1 + $0x10] sm:$0xff]  ;;  %v193_v36 = vld [vmem:[%s711_s1 + $0x18] sm:$0xff] }
   0x9   :  { %vm36_vm15 = vcmp.gt.s32.totalorder %v16_v20, 0  ;;  %v81_v23 = vsel %vm80_vm12, %v49_v17, 127  ;;  %v65_v24 = vsel %vm64_vm13, %v33_v18, 127  ;;  %vm82_vm0 = vcmp.lt.s32.totalorder %v51_v21, 127 }
   0xa   :  { %122 = vperm.xlu1 %557, %v79_v15   ;;  %119 = vperm.xlu0 %556, %v77_v16   ;;  %vm66_vm1 = vcmp.lt.s32.totalorder %v35_v22, 127  ;;  %v53_v27 = vsel %vm52_vm14, %v24_v19, 0  ;;  %v37_v28 = vsel %vm36_vm15, %v16_v20, 0  ;;  %vm54_vm2 = vcmp.gt.s32.totalorder %v25_v25, 0 }
   0xb   :  { %vm38_vm3 = vcmp.gt.s32.totalorder %v17_v26, 0  ;;  %v83_v30 = vsel %vm82_vm0, %v51_v21, 127  ;;  %v67_v31 = vsel %vm66_vm1, %v35_v22, 127  ;;  %vm84_vm4 = vcmp.lt.s32.totalorder %v53_v27, 127 }
   0xc   :  { %vm68_vm5 = vcmp.lt.s32.totalorder %v37_v28, 127 }
   0xe   :  { %125 = vperm.xlu1 %557, %v81_v23   ;;  %101 = vperm.xlu0 %556, %v65_v24  }
   0xf   :  { %7 = vsyncpa [#allocation3], 0  ;;  %v55_v37 = vsel %vm54_vm2, %v25_v25, 0  ;;  %v39_v38 = vsel %vm38_vm3, %v17_v26, 0  ;;  %vm56_vm6 = vcmp.gt.s32.totalorder %v26_v29, 0  ;;  %vm40_vm7 = vcmp.gt.s32.totalorder %v18_v32, 0 }
  0x10   :  { %v503_v39 = vpack.c.bf16 %v191_v34, %v190_v33  ;;  %v85_v40 = vsel %vm84_vm4, %v53_v27, 127  ;;  %v69_v41 = vsel %vm68_vm5, %v37_v28, 127  ;;  %v27_v42 = vld [vmem:[%s710_s0 + $0x78] sm:$0xff]  ;;  %v507_v44 = vpack.c.bf16 %v193_v36, %v192_v35  ;;  %v194_v45 = vld [vmem:[%s711_s1 + $0x20] sm:$0xff]  ;;  %v195_v46 = vld [vmem:[%s711_s1 + $0x28] sm:$0xff] }
  0x11   :  { %v19_v43 = vld [vmem:[%s710_s0 + $0x38] sm:$0xff]  ;;  %vm86_vm8 = vcmp.lt.s32.totalorder %v55_v37, 127  ;;  %vm70_vm9 = vcmp.lt.s32.totalorder %v39_v38, 127  ;;  %v57_v47 = vsel %vm56_vm6, %v26_v29, 0  ;;  %v41_v48 = vsel %vm40_vm7, %v18_v32, 0  ;;  %v196_v52 = vld [vmem:[%s711_s1 + $0x30] sm:$0xff] }
  0x12   :  { %128 = vperm.xlu1 %557, %v83_v30   ;;  %104 = vperm.xlu0 %556, %v67_v31   ;;  %vm58_vm10 = vcmp.gt.s32.totalorder %v27_v42, 0  ;;  %vm42_vm11 = vcmp.gt.s32.totalorder %v19_v43, 0  ;;  %v87_v49 = vsel %vm86_vm8, %v55_v37, 127  ;;  %v71_v50 = vsel %vm70_vm9, %v39_v38, 127  ;;  %v197_v53 = vld [vmem:[%s711_s1 + $0x38] sm:$0xff]  ;;  %v198_v59 = vld [vmem:[%s711_s1 + $0x40] sm:$0xff] }
  0x13   :  { %504 = vmatprep.subr.bf16.mxu0 %v503_v39  ;;  %535 = vmatprep.subr.bf16.mxu1 %v503_v39  ;;  %v511_v51 = vpack.c.bf16 %v195_v46, %v194_v45  ;;  %vm88_vm12 = vcmp.lt.s32.totalorder %v57_v47, 127  ;;  %vm72_vm13 = vcmp.lt.s32.totalorder %v41_v48, 127  ;;  %v59_v54 = vsel %vm58_vm10, %v27_v42, 0  ;;  %v199_v60 = vld [vmem:[%s711_s1 + $0x48] sm:$0xff]  ;;  %v200_v0 = vld [vmem:[%s711_s1 + $0x50] sm:$0xff]  ;;  %v201_v1 = vld [vmem:[%s711_s1 + $0x58] sm:$0xff] }
  0x14   :  { %506 = vmatpush3.bf16.msra.mxu0 %v503_v39  ;;  %543 = vmatpush3.bf16.msra.mxu1 %v503_v39  ;;  %v43_v55 = vsel %vm42_vm11, %v19_v43, 0  ;;  %v89_v56 = vsel %vm88_vm12, %v57_v47, 127  ;;  %v73_v57 = vsel %vm72_vm13, %v41_v48, 127  ;;  %v515_v58 = vpack.c.bf16 %v197_v53, %v196_v52  ;;  %v202_v3 = vld [vmem:[%s711_s1 + $0x60] sm:$0xff]  ;;  %v203_v4 = vld [vmem:[%s711_s1 + $0x68] sm:$0xff]  ;;  %v204_v6 = vld [vmem:[%s711_s1 + $0x70] sm:$0xff] }
  0x15   :  { %508 = vmatprep.subr.bf16.mxu0 %v507_v44  ;;  %536 = vmatprep.subr.bf16.mxu1 %v507_v44  ;;  %vm90_vm14 = vcmp.lt.s32.totalorder %v59_v54, 127  ;;  %vm74_vm15 = vcmp.lt.s32.totalorder %v43_v55, 127  ;;  %v519_v63 = vpack.c.bf16 %v199_v60, %v198_v59  ;;  %v523_v2 = vpack.c.bf16 %v201_v1, %v200_v0  ;;  %v205_v7 = vld [vmem:[%s711_s1 + $0x78] sm:$0xff]  ;;  %s584_s1 = smov [#allocation2]  }
  0x16   :  { %131 = vperm.xlu1 %557, %v85_v40   ;;  %107 = vperm.xlu0 %556, %v69_v41   ;;  %v91_v61 = vsel %vm90_vm14, %v59_v54, 127  ;;  %v75_v62 = vsel %vm74_vm15, %v43_v55, 127  ;;  %v527_v5 = vpack.c.bf16 %v203_v4, %v202_v3  ;;  %v531_v8 = vpack.c.bf16 %v205_v7, %v204_v6  ;;  %s372_s16 = sshll.u32 %s584_s1, 4  ;;  %s373_s16 = int_to_ptr.vmem [resolvable:$true] %s372_s16 }
  0x17   :  { %v92_v9 = vlaneseq  ;;  %v583_v13 = vmov 1.0   ;;  %s558_s17 = scalar_lea.vmem %s373_s16, 2048  ;;  %p563_p1 = scmp.lt.s32.totalorder %s373_s16, %s373_s16 }
  0x18   :  { %510 = vmatpush3.bf16.msra.mxu0 %v507_v44  ;;  %544 = vmatpush3.bf16.msra.mxu1 %v507_v44  ;;  %p559_p0 = scmp.ne.s32.totalorder %s373_s16, %s558_s17  ;;  %p564_p2 = scmp.lt.s32.totalorder %s558_s17, %s558_s17 }
  0x19   :  { %512 = vmatprep.subr.bf16.mxu0 %v511_v51  ;;  %537 = vmatprep.subr.bf16.mxu1 %v511_v51  ;;  %v93_v10 = vand.u32 127, %v92_v9 }
  0x1a   :  { %134 = vperm.xlu1 %557, %v87_v49   ;;  %110 = vperm.xlu0 %556, %v71_v50   ;;  %p565_p3 = por %p564_p2, %p563_p1 }
  0x1c   :  { %514 = vmatpush3.bf16.msra.mxu0 %v511_v51  ;;  %545 = vmatpush3.bf16.msra.mxu1 %v511_v51  ;;  %p566_p4 = pnand %p565_p3, %p559_p0 }
  0x1d   :  { %516 = vmatprep.subr.bf16.mxu0 %v515_v58  ;;  %538 = vmatprep.subr.bf16.mxu1 %v515_v58 }
  0x1e   :  { %137 = vperm.xlu1 %557, %v89_v56   ;;  %113 = vperm.xlu0 %556, %v73_v57  }
  0x20   :  { %518 = vmatpush3.bf16.msra.mxu0 %v515_v58  ;;  %546 = vmatpush3.bf16.msra.mxu1 %v515_v58 }
  0x21   :  { %520 = vmatprep.subr.bf16.mxu0 %v519_v63  ;;  %539 = vmatprep.subr.bf16.mxu1 %v519_v63 }
  0x22   :  { %140 = vperm.xlu1 %557, %v91_v61   ;;  %116 = vperm.xlu0 %556, %v75_v62  }
  0x24   :  { %522 = vmatpush3.bf16.msra.mxu0 %v519_v63  ;;  %547 = vmatpush3.bf16.msra.mxu1 %v519_v63 }
  0x25   :  { %524 = vmatprep.subr.bf16.mxu0 %v523_v2  ;;  %540 = vmatprep.subr.bf16.mxu1 %v523_v2 }
  0x28   :  { %526 = vmatpush3.bf16.msra.mxu0 %v523_v2  ;;  %548 = vmatpush3.bf16.msra.mxu1 %v523_v2 }
  0x29   :  { %528 = vmatprep.subr.bf16.mxu0 %v527_v5  ;;  %541 = vmatprep.subr.bf16.mxu1 %v527_v5 }
  0x2c   :  { %530 = vmatpush3.bf16.msra.mxu0 %v527_v5  ;;  %549 = vmatpush3.bf16.msra.mxu1 %v527_v5 }
  0x2d   :  { %532 = vmatprep.subr.bf16.mxu0 %v531_v8  ;;  %542 = vmatprep.subr.bf16.mxu1 %v531_v8 }
  0x30   :  { %534 = vmatpush3.bf16.msra.mxu0 %v531_v8  ;;  %550 = vmatpush3.bf16.msra.mxu1 %v531_v8 }
  0x85   :  { %v99_v11 = vpop.permute.xlu1 %98  ;;  %v96_v12 = vpop.permute.xlu0 %95 }
  0x86   :  { %vm143_vm0 = vcmp.eq.s32.totalorder %v93_v10, %v99_v11  ;;  %vm142_vm1 = vcmp.eq.s32.totalorder %v93_v10, %v96_v12 }
  0x87   :  { %479 = vmatprep.mubr.msk.f32.mxu0 %vm142_vm1, %v583_v13 }
  0x88   :  { %480 = vmatmul.mubr.msk.f32.vlgmr.msra.gmra.mrb[0].mxu0 %vm143_vm0, %v583_v13 }
  0x89   :  { %v123_v14 = vpop.permute.xlu1 %122  ;;  %v120_v15 = vpop.permute.xlu0 %119 }
  0x8a   :  { %vm151_vm2 = vcmp.eq.s32.totalorder %v93_v10, %v123_v14  ;;  %vm150_vm3 = vcmp.eq.s32.totalorder %v93_v10, %v120_v15 }
  0x8b   :  { %491 = vmatprep.mubr.msk.f32.mxu1 %vm150_vm3, %v583_v13 }
  0x8c   :  { %492 = vmatmul.mubr.msk.f32.vlgmr.msra.gmra.mrb[0].mxu1 %vm151_vm2, %v583_v13 }
  0x8d   :  { %v126_v16 = vpop.permute.xlu1 %125  ;;  %v102_v17 = vpop.permute.xlu0 %101 }
  0x8e   :  { %vm152_vm4 = vcmp.eq.s32.totalorder %v93_v10, %v126_v16  ;;  %vm144_vm5 = vcmp.eq.s32.totalorder %v93_v10, %v102_v17 }
  0x8f   :  { %482 = vmatprep.mubr.msk.f32.mxu0 %vm144_vm5, %v583_v13  ;;  %494 = vmatprep.mubr.msk.f32.mxu1 %vm152_vm4, %v583_v13 }
  0x91   :  { %v129_v18 = vpop.permute.xlu1 %128  ;;  %v105_v19 = vpop.permute.xlu0 %104 }
  0x92   :  { %vm153_vm6 = vcmp.eq.s32.totalorder %v93_v10, %v129_v18  ;;  %vm145_vm7 = vcmp.eq.s32.totalorder %v93_v10, %v105_v19 }
  0x93   :  { %483 = vmatmul.mubr.msk.f32.gmra.mrb[2].mxu0 %vm145_vm7, %v583_v13  ;;  %495 = vmatmul.mubr.msk.f32.gmra.mrb[2].mxu1 %vm153_vm6, %v583_v13 }
  0x95   :  { %v132_v20 = vpop.permute.xlu1 %131  ;;  %v108_v21 = vpop.permute.xlu0 %107 }
  0x96   :  { %vm154_vm8 = vcmp.eq.s32.totalorder %v93_v10, %v132_v20  ;;  %vm146_vm9 = vcmp.eq.s32.totalorder %v93_v10, %v108_v21 }
  0x97   :  { %485 = vmatprep.mubr.msk.f32.mxu0 %vm146_vm9, %v583_v13  ;;  %497 = vmatprep.mubr.msk.f32.mxu1 %vm154_vm8, %v583_v13 }
  0x99   :  { %v135_v22 = vpop.permute.xlu1 %134  ;;  %v111_v23 = vpop.permute.xlu0 %110 }
  0x9a   :  { %vm155_vm10 = vcmp.eq.s32.totalorder %v93_v10, %v135_v22  ;;  %vm147_vm11 = vcmp.eq.s32.totalorder %v93_v10, %v111_v23 }
  0x9b   :  { %486 = vmatmul.mubr.msk.f32.gmra.mrb[4].mxu0 %vm147_vm11, %v583_v13  ;;  %498 = vmatmul.mubr.msk.f32.gmra.mrb[4].mxu1 %vm155_vm10, %v583_v13 }
  0x9d   :  { %v138_v24 = vpop.permute.xlu1 %137  ;;  %v114_v25 = vpop.permute.xlu0 %113 }
  0x9e   :  { %vm156_vm12 = vcmp.eq.s32.totalorder %v93_v10, %v138_v24  ;;  %vm148_vm13 = vcmp.eq.s32.totalorder %v93_v10, %v114_v25 }
  0x9f   :  { %488 = vmatprep.mubr.msk.f32.mxu0 %vm148_vm13, %v583_v13  ;;  %500 = vmatprep.mubr.msk.f32.mxu1 %vm156_vm12, %v583_v13 }
  0xa1   :  { %v141_v26 = vpop.permute.xlu1 %140  ;;  %v117_v27 = vpop.permute.xlu0 %116 }
  0xa2   :  { %vm157_vm14 = vcmp.eq.s32.totalorder %v93_v10, %v141_v26  ;;  %vm149_vm15 = vcmp.eq.s32.totalorder %v93_v10, %v117_v27 }
  0xa3   :  { %489 = vmatmul.mubr.msk.f32.gmra.mrb[6].mxu0 %vm149_vm15, %v583_v13  ;;  %501 = vmatmul.mubr.msk.f32.gmra.mrb[6].mxu1 %vm157_vm14, %v583_v13 }
 0x15b   :  { %v481_v28 = vpop.f32.mrb[0].mxu0 }
 0x15c   :  { %352 = vst [vmem:[#allocation2 + $0x8] sm:$0xff] %v481_v28  ;;  %v272_v29 = vpop.f32.mrb[1].mxu0 }
 0x15d   :  { %351 = vst [vmem:[#allocation2] sm:$0xff] %v272_v29 }
 0x15f   :  { %v493_v30 = vpop.f32.mrb[0].mxu1 }
 0x160   :  { %360 = vst [vmem:[#allocation2 + $0x48] sm:$0xff] %v493_v30  ;;  %v312_v31 = vpop.f32.mrb[1].mxu1 }
 0x161   :  { %359 = vst [vmem:[#allocation2 + $0x40] sm:$0xff] %v312_v31 }
 0x166   :  { %v484_v32 = vpop.f32.mrb[2].mxu0  ;;  %v496_v33 = vpop.f32.mrb[2].mxu1 }
 0x167   :  { %354 = vst [vmem:[#allocation2 + $0x18] sm:$0xff] %v484_v32  ;;  %362 = vst [vmem:[#allocation2 + $0x58] sm:$0xff] %v496_v33  ;;  %v282_v34 = vpop.f32.mrb[3].mxu0  ;;  %v322_v35 = vpop.f32.mrb[3].mxu1 }
 0x168   :  { %353 = vst [vmem:[#allocation2 + $0x10] sm:$0xff] %v282_v34  ;;  %361 = vst [vmem:[#allocation2 + $0x50] sm:$0xff] %v322_v35 }
 0x16e   :  { %v487_v36 = vpop.f32.mrb[4].mxu0  ;;  %v499_v37 = vpop.f32.mrb[4].mxu1 }
 0x16f   :  { %356 = vst [vmem:[#allocation2 + $0x28] sm:$0xff] %v487_v36  ;;  %364 = vst [vmem:[#allocation2 + $0x68] sm:$0xff] %v499_v37  ;;  %v292_v38 = vpop.f32.mrb[5].mxu0  ;;  %v332_v39 = vpop.f32.mrb[5].mxu1 }
 0x170   :  { %355 = vst [vmem:[#allocation2 + $0x20] sm:$0xff] %v292_v38  ;;  %363 = vst [vmem:[#allocation2 + $0x60] sm:$0xff] %v332_v39 }
 0x176   :  { %v490_v40 = vpop.f32.mrb[6].mxu0  ;;  %v502_v41 = vpop.f32.mrb[6].mxu1 }
 0x177   :  { %358 = vst [vmem:[#allocation2 + $0x38] sm:$0xff] %v490_v40  ;;  %366 = vst [vmem:[#allocation2 + $0x78] sm:$0xff] %v502_v41  ;;  %v302_v42 = vpop.f32.mrb[7].mxu0  ;;  %v342_v43 = vpop.f32.mrb[7].mxu1 }
 0x178   :  { %357 = vst [vmem:[#allocation2 + $0x30] sm:$0xff] %v302_v42  ;;  %365 = vst [vmem:[#allocation2 + $0x70] sm:$0xff] %v342_v43 }
 0x179   :  { %569 = shalt.err (!%p566_p4)
}
 0x17a   :  { %s570_s20 = scalar_lea.hbm %s712_s2, 2048 }
 0x17b   :  { %p571_p5 = scmp.ne.s32.totalorder %s712_s2, %s570_s20  ;;  %p574_p6 = scmp.lt.u32.totalorder %s570_s20, %s712_s2 }
 0x17d   :  { %p576_p7 = pnand %p574_p6, %p571_p5 }
 0x17f   :  { %579 = shalt.err (!%p576_p7)
}
 0x180   :  { %s585_s0 = smov 128   ;;  %s586_s25 = smov 8  }
 0x181   :  { %378 = dma.vmem_to_hbm [thread:$0]  %s373_s16, 2048, %s712_s2, [#allocation3], %s585_s0, %s585_s0, %s586_s25  }
 0x182   :  { %580 = dma.done.wait [#allocation3], 2048  }
 0x183   :  { %581 = vsyncadd [#allocation3], 4294965248 }
 0x184   :  { %382 = vsyncpa [#allocation3], 1 }

</bundles_post_ra>
